<compile_context>
chip_gen: v7x
topology: tpu7x:2x2x1
jax: 0.10.0
libtpu: 0.0.40
codegen_flags: <defaults>
</compile_context>

<pallas_src>
import numpy as np
import jax
import jax.numpy as jnp
from jax.experimental import pallas as pl
from jax.experimental.pallas import tpu as pltpu


# ----------------------------------------------------------------------------
# Reference-only: explicit Haar DWT matrices (used to prove semantics).
# ----------------------------------------------------------------------------
def _haar_dwt_matrices(H, W, dtype=jnp.float32):
    s = 1.0 / np.sqrt(2.0)
    ml0 = np.zeros((H // 2, H), np.float32)
    mh0 = np.zeros((H // 2, H), np.float32)
    for i in range(H // 2):
        ml0[i, 2 * i] = s
        ml0[i, 2 * i + 1] = s
        mh0[i, 2 * i] = -s
        mh0[i, 2 * i + 1] = s
    ml1 = np.zeros((W, W // 2), np.float32)
    mh1 = np.zeros((W, W // 2), np.float32)
    for j in range(W // 2):
        ml1[2 * j, j] = s
        ml1[2 * j + 1, j] = s
        mh1[2 * j, j] = -s
        mh1[2 * j + 1, j] = s
    return (jnp.asarray(ml0, dtype), jnp.asarray(mh0, dtype),
            jnp.asarray(ml1, dtype), jnp.asarray(mh1, dtype))


# ----------------------------------------------------------------------------
# Kernel path.
# ----------------------------------------------------------------------------
def _build_selector(W, R):
    """Block-diagonal selector (R*2W, R*W//2): picks odd-H/odd-W, scaled 0.5.

    Each input "chunk" of 2*W lanes is [even-H row | odd-H row] of one image
    row-pair; the selector routes element (odd-H, 2*j+1) of chunk r to output
    column r*Wo + j, which is exactly the contiguous output layout.
    """
    Wo = W // 2
    S = np.zeros((R * 2 * W, R * Wo), np.float32)
    for r in range(R):
        in_base = r * 2 * W + W      # start of the odd-H row inside chunk r
        out_base = r * Wo
        for j in range(Wo):
            S[in_base + 2 * j + 1, out_base + j] = 0.5
    return jnp.asarray(S)


def _downsample_kernel(x_ref, s_ref, o_ref):
    # x_ref: (TM, R*2W)  s_ref: (R*2W, R*Wo)  o_ref: (TM, R*Wo)
    x = x_ref[...].astype(jnp.float32)
    y = jnp.dot(x, s_ref[...], preferred_element_type=jnp.float32)
    o_ref[...] = y.astype(o_ref.dtype)


def downsample(x, *, block_rows=None, target_out_lanes=256):
    """x: (N, C, H, W), H and W even. Returns (N, C, H//2, W//2)."""
    N, C, H, W = x.shape
    assert H % 2 == 0 and W % 2 == 0, "Haar DWT downsample needs even H, W"
    Ho, Wo = H // 2, W // 2
    M = N * C * Ho                       # number of (2, W) row-pair chunks

    # Merge R consecutive chunks per matmul row so input/output lane widths
    # are large (>=128 when possible).  R must divide M for a free reshape.
    r_max = max(1, target_out_lanes // Wo)
    R = 1
    for cand in range(1, r_max + 1):
        if M % cand == 0:
            R = cand
    Mr = M // R
    lanes_in = R * 2 * W
    lanes_out = R * Wo

    if block_rows is None:
        # ~2 MiB input block, multiple of 8 sublanes.
        tm = max(8, min(512, (2 * 1024 * 1024) // (lanes_in * 4)))
        tm = (tm // 8) * 8
        block_rows = min(Mr, tm)
    TM = block_rows
    if TM != Mr:
        assert TM % 8 == 0, "block_rows must be a multiple of 8 (or all rows)"
    grid = (pl.cdiv(Mr, TM),)

    x2 = x.reshape(Mr, lanes_in)         # contiguous -> free reshape
    S = _build_selector(W, R)

    out2 = pl.pallas_call(
        _downsample_kernel,
        out_shape=jax.ShapeDtypeStruct((Mr, lanes_out), x.dtype),
        grid=grid,
        in_specs=[
            pl.BlockSpec((TM, lanes_in), lambda i: (i, 0)),
            pl.BlockSpec((lanes_in, lanes_out), lambda i: (0, 0)),  # constant
        ],
        out_specs=pl.BlockSpec((TM, lanes_out), lambda i: (i, 0)),
        compiler_params=pltpu.CompilerParams(
            dimension_semantics=("parallel",),
            vmem_limit_bytes=32 * 1024 * 1024,
        ),
    )(x2, S)

    return out2.reshape(N, C, Ho, Wo)


# ----------------------------------------------------------------------------
# Plain-JAX reference: full 4-subband DWT + average (the module's definition).
# ----------------------------------------------------------------------------
def _reference(x):
    N, C, H, W = x.shape
    ml0, mh0, ml1, mh1 = _haar_dwt_matrices(H, W, jnp.float32)
    xf = x.astype(jnp.float32)
    L = jnp.einsum('ph,nchw->ncpw', ml0, xf)
    Hh = jnp.einsum('ph,nchw->ncpw', mh0, xf)
    LL = jnp.einsum('ncpw,wq->ncpq', L, ml1)
    LH = jnp.einsum('ncpw,wq->ncpq', L, mh1)
    HL = jnp.einsum('ncpw,wq->ncpq', Hh, ml1)
    HH = jnp.einsum('ncpw,wq->ncpq', Hh, mh1)
    return ((LL + LH + HL + HH) / 4.0).astype(x.dtype)


if __name__ == "__main__":
    key = jax.random.PRNGKey(0)
    k0, k1 = jax.random.split(key)

    # Primary test (module-scale shapes).
    x = jax.random.normal(k0, (2, 4, 16, 16), dtype=jnp.float32)
    out = jax.block_until_ready(downsample(x))
    assert out.shape == (2, 4, 8, 8), out.shape
    np.testing.assert_allclose(np.asarray(out), np.asarray(_reference(x)),
                               rtol=1e-5, atol=1e-5)

    # Exercise multi-block grid + partial last block.
    x2 = jax.random.normal(k1, (2, 8, 64, 64), dtype=jnp.float32)
    out2 = jax.block_until_ready(downsample(x2, block_rows=24))
    assert out2.shape == (2, 8, 32, 32), out2.shape
    np.testing.assert_allclose(np.asarray(out2), np.asarray(_reference(x2)),
                               rtol=1e-5, atol=1e-5)

    print("KERNEL_OK")
</pallas_src>

<mosaic_0001>
module attributes {stable_mosaic.version = 11 : i64} {
  func.func @_downsample_kernel(%arg0: i32, %arg1: memref<2x1024xf32, #tpu.memory_space<vmem>>, %arg2: memref<1024x256xf32, #tpu.memory_space<vmem>>, %arg3: memref<2x256xf32, #tpu.memory_space<vmem>>) attributes {dimension_semantics = [#tpu.dimension_semantics<parallel>], iteration_bounds = array<i64: 1>, scalar_prefetch = 0 : i64, scratch_operands = 0 : i64, tpu.core_type = #tpu.core_type<tc>, window_params = [{transform_indices = @transform_0, window_bounds = array<i64: 2, 1024>}, {pipeline_mode = #tpu.pipeline_mode<synchronous>, transform_indices = @transform_1, window_bounds = array<i64: 1024, 256>}, {transform_indices = @transform_2, window_bounds = array<i64: 2, 256>}]} {
    %c0 = arith.constant 0 : index
    %c0_0 = arith.constant 0 : index
    %0 = vector.load %arg1[%c0, %c0_0] : memref<2x1024xf32, #tpu.memory_space<vmem>>, vector<2x1024xf32>
    %c0_1 = arith.constant 0 : index
    %c0_2 = arith.constant 0 : index
    %1 = vector.load %arg2[%c0_1, %c0_2] : memref<1024x256xf32, #tpu.memory_space<vmem>>, vector<1024x256xf32>
    %cst = arith.constant dense<0.000000e+00> : vector<2x256xf32>
    %2 = tpu.matmul %0, %1, %cst {dimension_numbers = #tpu.dot_dimension_numbers<[1], [0], [0], [1], [0, 0, 1, 1], [], []>} : vector<2x1024xf32>, vector<1024x256xf32>, vector<2x256xf32> -> vector<2x256xf32>
    %c0_3 = arith.constant 0 : index
    %c0_4 = arith.constant 0 : index
    %3 = vector.load %arg3[%c0_3, %c0_4] : memref<2x256xf32, #tpu.memory_space<vmem>>, vector<2x256xf32>
    tpu.vector_store %arg3[%c0_3, %c0_4], %2 {strides = array<i32>} : memref<2x256xf32, #tpu.memory_space<vmem>>, vector<2x256xf32>,
    return
  }
  func.func @transform_0(%arg0: i32) -> (i32, i32) {
    %c0_i32 = arith.constant 0 : i32
    %c0_i32_0 = arith.constant 0 : i32
    return %arg0, %c0_i32 : i32, i32
  }
  func.func @transform_1(%arg0: i32) -> (i32, i32) {
    %c0_i32 = arith.constant 0 : i32
    %c0_i32_0 = arith.constant 0 : i32
    %c0_i32_1 = arith.constant 0 : i32
    return %c0_i32, %c0_i32_0 : i32, i32
  }
  func.func @transform_2(%arg0: i32) -> (i32, i32) {
    %c0_i32 = arith.constant 0 : i32
    %c0_i32_0 = arith.constant 0 : i32
    return %arg0, %c0_i32 : i32, i32
  }
}

</mosaic_0001>

<bundles_post_ra>
// kernel: tpu_custom_call.1
= control target key start
LH: loop header
LB: loop body
LE: loop exit
PB: predicated region body
PF: predicated region fallthrough
CT: control target
= control target key end

     0   :  { %7 = vsyncpa [#allocation3], 0  ;;  %s1095_s0 = inlined_call_operand.hbm [shape: f32[2,1024], index: 0, kind: input, shape index: {}]   ;;  %s1096_s1 = inlined_call_operand.hbm [shape: f32[1024,256], index: 1, kind: input, shape index: {}]   ;;  %s1097_s2 = inlined_call_operand.hbm [shape: f32[2,256], index: 2, kind: output, shape index: {}]  }
   0x1   :  { %8 = vsyncpa [#allocation6], 0 }
   0x2   :  { %9 = vsyncpa [#allocation4], 0  ;;  %s995_s9 = smov [#allocation2]   ;;  %s996_s11 = smov [#allocation5]  }
   0x3   :  { %s16_s10 = sshll.u32 %s995_s9, 4  ;;  %s25_s12 = sshll.u32 %s996_s11, 4  ;;  %s17_s10 = int_to_ptr.vmem [resolvable:$true] %s16_s10  ;;  %s1016_s12 = int_to_ptr.vmem [resolvable:$true] %s25_s12 }
   0x4   :  { %s923_s15 = scalar_lea.hbm %s1095_s0, 256 }
   0x5   :  { %p924_p0 = scmp.ne.s32.totalorder %s1095_s0, %s923_s15  ;;  %p927_p1 = scmp.lt.u32.totalorder %s923_s15, %s1095_s0 }
   0x7   :  { %p929_p2 = pnand %p927_p1, %p924_p0 }
   0x9   :  { %932 = shalt.err (!%p929_p2)
}
   0xa   :  { %s933_s20 = scalar_lea.vmem %s17_s10, 256  ;;  %p938_p4 = scmp.lt.s32.totalorder %s17_s10, %s17_s10 }
   0xb   :  { %p934_p3 = scmp.ne.s32.totalorder %s17_s10, %s933_s20  ;;  %p939_p5 = scmp.lt.s32.totalorder %s933_s20, %s933_s20 }
   0xd   :  { %p940_p6 = por %p939_p5, %p938_p4 }
   0xf   :  { %p941_p7 = pnand %p940_p6, %p934_p3 }
  0x11   :  { %944 = shalt.err (!%p941_p7)
}
  0x12   :  { %19 = dma.hbm_to_vmem [thread:$0]  %s1095_s0, 256, %s17_s10, [#allocation3]  }
  0x13   :  { %s945_s25 = scalar_lea.hbm %s1096_s1, 32768 }
  0x14   :  { %p946_p8 = scmp.ne.s32.totalorder %s1096_s1, %s945_s25  ;;  %p949_p9 = scmp.lt.u32.totalorder %s945_s25, %s1096_s1 }
  0x16   :  { %p951_p10 = pnand %p949_p9, %p946_p8 }
  0x18   :  { %954 = shalt.err (!%p951_p10)
}
  0x19   :  { %s955_s30 = scalar_lea.vmem %s1016_s12, 32768  ;;  %p960_p12 = scmp.lt.s32.totalorder %s1016_s12, %s1016_s12 }
  0x1a   :  { %p956_p11 = scmp.ne.s32.totalorder %s1016_s12, %s955_s30  ;;  %p961_p13 = scmp.lt.s32.totalorder %s955_s30, %s955_s30 }
  0x1c   :  { %p962_p0 = por %p961_p13, %p960_p12 }
  0x1e   :  { %p963_p1 = pnand %p962_p0, %p956_p11 }
  0x20   :  { %966 = shalt.err (!%p963_p1)
}
  0x21   :  { %s997_s0 = smov 256   ;;  %s998_s3 = smov 16  }
  0x22   :  { %31 = dma.hbm_to_vmem [thread:$0]  %s1096_s1, 32768, %s1016_s12, [#allocation6], %s997_s0, %s997_s0, %s998_s3  }
  0x23   :  { %989 = dma.done.wait [#allocation3], 256  }
  0x24   :  { %990 = vsyncadd [#allocation3], 4294967040 }
  0x25   :  { %991 = dma.done.wait [#allocation6], 32768  }
  0x26   :  { %992 = vsyncadd [#allocation6], 4294934528  ;;  %v41_v0 = vld [vmem:[#allocation5 + $0x8] sm:$0xff]  ;;  %v43_v1 = vld [vmem:[#allocation5 + $0x18] sm:$0xff]  ;;  %s1000_s1 = smov [#allocation7]  }
  0x27   :  { %v169_v2 = vld [vmem:[#allocation5 + $0x408] sm:$0xff]  ;;  %v653_v3 = vpack.c.bf16 %v43_v1, %v41_v0  ;;  %v171_v4 = vld [vmem:[#allocation5 + $0x418] sm:$0xff]  ;;  %v40_v5 = vld [vmem:[#allocation5] sm:$0xff]  ;;  %s642_s6 = sshll.u32 %s1000_s1, 4  ;;  %s643_s6 = int_to_ptr.vmem [resolvable:$true] %s642_s6 }
  0x28   :  { %v42_v6 = vld [vmem:[#allocation5 + $0x10] sm:$0xff]  ;;  %v781_v7 = vpack.c.bf16 %v171_v4, %v169_v2  ;;  %v168_v9 = vld [vmem:[#allocation5 + $0x400] sm:$0xff]  ;;  %v45_v11 = vld [vmem:[#allocation5 + $0x28] sm:$0xff]  ;;  %s967_s7 = scalar_lea.vmem %s643_s6, 64  ;;  %p972_p3 = scmp.lt.s32.totalorder %s643_s6, %s643_s6 }
  0x29   :  { %v655_v8 = vpack.c.bf16 %v42_v6, %v40_v5  ;;  %v170_v10 = vld [vmem:[#allocation5 + $0x410] sm:$0xff]  ;;  %654 = vmatprep.subr.bf16.mxu1 %v653_v3  ;;  %v47_v13 = vld [vmem:[#allocation5 + $0x38] sm:$0xff]  ;;  %v173_v14 = vld [vmem:[#allocation5 + $0x428] sm:$0xff]  ;;  %p968_p2 = scmp.ne.s32.totalorder %s643_s6, %s967_s7  ;;  %p973_p4 = scmp.lt.s32.totalorder %s967_s7, %s967_s7 }
  0x2a   :  { %v783_v12 = vpack.c.bf16 %v170_v10, %v168_v9  ;;  %v175_v15 = vld [vmem:[#allocation5 + $0x438] sm:$0xff]  ;;  %782 = vmatprep.subr.bf16.mxu0 %v781_v7  ;;  %v657_v16 = vpack.c.bf16 %v47_v13, %v45_v11  ;;  %v44_v18 = vld [vmem:[#allocation5 + $0x20] sm:$0xff]  ;;  %v46_v19 = vld [vmem:[#allocation5 + $0x30] sm:$0xff] }
  0x2b   :  { %656 = vmatpush1.bf16.msra.mxu1 %v655_v8  ;;  %v785_v17 = vpack.c.bf16 %v175_v15, %v173_v14  ;;  %v172_v20 = vld [vmem:[#allocation5 + $0x420] sm:$0xff]  ;;  %v659_v21 = vpack.c.bf16 %v46_v19, %v44_v18  ;;  %v174_v22 = vld [vmem:[#allocation5 + $0x430] sm:$0xff]  ;;  %v49_v23 = vld [vmem:[#allocation5 + $0x48] sm:$0xff]  ;;  %p974_p5 = por %p973_p4, %p972_p3 }
  0x2c   :  { %784 = vmatpush1.bf16.msra.mxu0 %v783_v12  ;;  %v51_v24 = vld [vmem:[#allocation5 + $0x58] sm:$0xff]  ;;  %658 = vmatprep.subr.bf16.mxu1 %v657_v16  ;;  %v787_v25 = vpack.c.bf16 %v174_v22, %v172_v20  ;;  %v177_v27 = vld [vmem:[#allocation5 + $0x448] sm:$0xff]  ;;  %v48_v29 = vld [vmem:[#allocation5 + $0x40] sm:$0xff] }
  0x2d   :  { %786 = vmatprep.subr.bf16.mxu0 %v785_v17  ;;  %v661_v26 = vpack.c.bf16 %v51_v24, %v49_v23  ;;  %v179_v28 = vld [vmem:[#allocation5 + $0x458] sm:$0xff]  ;;  %v50_v31 = vld [vmem:[#allocation5 + $0x50] sm:$0xff]  ;;  %v176_v32 = vld [vmem:[#allocation5 + $0x440] sm:$0xff]  ;;  %p975_p6 = pnand %p974_p5, %p968_p2 }
  0x2e   :  { %v789_v30 = vpack.c.bf16 %v179_v28, %v177_v27  ;;  %v178_v33 = vld [vmem:[#allocation5 + $0x450] sm:$0xff]  ;;  %v663_v34 = vpack.c.bf16 %v50_v31, %v48_v29  ;;  %v53_v35 = vld [vmem:[#allocation5 + $0x68] sm:$0xff]  ;;  %v55_v36 = vld [vmem:[#allocation5 + $0x78] sm:$0xff] }
  0x2f   :  { %660 = vmatpush1.bf16.msra.mxu1 %v659_v21  ;;  %v181_v37 = vld [vmem:[#allocation5 + $0x468] sm:$0xff]  ;;  %v791_v38 = vpack.c.bf16 %v178_v33, %v176_v32  ;;  %v665_v39 = vpack.c.bf16 %v55_v36, %v53_v35  ;;  %v183_v40 = vld [vmem:[#allocation5 + $0x478] sm:$0xff]  ;;  %v52_v41 = vld [vmem:[#allocation5 + $0x60] sm:$0xff] }
  0x30   :  { %788 = vmatpush1.bf16.msra.mxu0 %v787_v25  ;;  %662 = vmatprep.subr.bf16.mxu1 %v661_v26  ;;  %v54_v42 = vld [vmem:[#allocation5 + $0x70] sm:$0xff]  ;;  %v793_v43 = vpack.c.bf16 %v183_v40, %v181_v37  ;;  %v180_v44 = vld [vmem:[#allocation5 + $0x460] sm:$0xff]  ;;  %v57_v46 = vld [vmem:[#allocation5 + $0x88] sm:$0xff] }
  0x31   :  { %790 = vmatprep.subr.bf16.mxu0 %v789_v30  ;;  %v182_v45 = vld [vmem:[#allocation5 + $0x470] sm:$0xff]  ;;  %v59_v47 = vld [vmem:[#allocation5 + $0x98] sm:$0xff]  ;;  %v185_v48 = vld [vmem:[#allocation5 + $0x488] sm:$0xff]  ;;  %v667_v50 = vpack.c.bf16 %v54_v42, %v52_v41 }
  0x32   :  { %v187_v49 = vld [vmem:[#allocation5 + $0x498] sm:$0xff]  ;;  %v795_v51 = vpack.c.bf16 %v182_v45, %v180_v44  ;;  %v669_v52 = vpack.c.bf16 %v59_v47, %v57_v46  ;;  %v56_v53 = vld [vmem:[#allocation5 + $0x80] sm:$0xff]  ;;  %v58_v54 = vld [vmem:[#allocation5 + $0x90] sm:$0xff]  ;;  %v999_v46 = vmov 1983009808  }
  0x33   :  { %664 = vmatpush1.bf16.msra.mxu1 %v663_v34  ;;  %v184_v55 = vld [vmem:[#allocation5 + $0x480] sm:$0xff]  ;;  %v797_v56 = vpack.c.bf16 %v187_v49, %v185_v48  ;;  %v186_v57 = vld [vmem:[#allocation5 + $0x490] sm:$0xff]  ;;  %v61_v58 = vld [vmem:[#allocation5 + $0xa8] sm:$0xff]  ;;  %v671_v62 = vpack.c.bf16 %v58_v54, %v56_v53  ;;  %v300_v47 = vunpack.c.l.s4 %v999_v46  ;;  %v302_v48 = vlaneseq }
  0x34   :  { %792 = vmatpush1.bf16.msra.mxu0 %v791_v38  ;;  %666 = vmatprep.subr.bf16.mxu1 %v665_v39  ;;  %v63_v59 = vld [vmem:[#allocation5 + $0xb8] sm:$0xff]  ;;  %v189_v60 = vld [vmem:[#allocation5 + $0x4a8] sm:$0xff]  ;;  %v799_v63 = vpack.c.bf16 %v186_v57, %v184_v55  ;;  %v60_v1 = vld [vmem:[#allocation5 + $0xa0] sm:$0xff] }
  0x35   :  { %794 = vmatprep.subr.bf16.mxu0 %v793_v43  ;;  %v191_v61 = vld [vmem:[#allocation5 + $0x4b8] sm:$0xff]  ;;  %v673_v0 = vpack.c.bf16 %v63_v59, %v61_v58  ;;  %v62_v2 = vld [vmem:[#allocation5 + $0xb0] sm:$0xff]  ;;  %v188_v3 = vld [vmem:[#allocation5 + $0x4a0] sm:$0xff] }
  0x36   :  { %v801_v4 = vpack.c.bf16 %v191_v61, %v189_v60  ;;  %v190_v5 = vld [vmem:[#allocation5 + $0x4b0] sm:$0xff]  ;;  %v65_v6 = vld [vmem:[#allocation5 + $0xc8] sm:$0xff]  ;;  %v67_v7 = vld [vmem:[#allocation5 + $0xd8] sm:$0xff]  ;;  %v675_v10 = vpack.c.bf16 %v62_v2, %v60_v1  ;;  %v301_v61 = vunpack.c.0.s8 %v300_v47 }
  0x37   :  { %668 = vmatpush1.bf16.msra.mxu1 %v667_v50  ;;  %v193_v8 = vld [vmem:[#allocation5 + $0x4c8] sm:$0xff]  ;;  %v195_v9 = vld [vmem:[#allocation5 + $0x4d8] sm:$0xff]  ;;  %v803_v11 = vpack.c.bf16 %v190_v5, %v188_v3  ;;  %v677_v12 = vpack.c.bf16 %v67_v7, %v65_v6  ;;  %v64_v13 = vld [vmem:[#allocation5 + $0xc0] sm:$0xff] }
  0x38   :  { %796 = vmatpush1.bf16.msra.mxu0 %v795_v51  ;;  %670 = vmatprep.subr.bf16.mxu1 %v669_v52  ;;  %v66_v14 = vld [vmem:[#allocation5 + $0xd0] sm:$0xff]  ;;  %v192_v15 = vld [vmem:[#allocation5 + $0x4c0] sm:$0xff]  ;;  %v805_v16 = vpack.c.bf16 %v195_v9, %v193_v8  ;;  %v69_v18 = vld [vmem:[#allocation5 + $0xe8] sm:$0xff] }
  0x39   :  { %798 = vmatprep.subr.bf16.mxu0 %v797_v56  ;;  %v194_v17 = vld [vmem:[#allocation5 + $0x4d0] sm:$0xff]  ;;  %v71_v19 = vld [vmem:[#allocation5 + $0xf8] sm:$0xff]  ;;  %v197_v20 = vld [vmem:[#allocation5 + $0x4e8] sm:$0xff]  ;;  %v679_v22 = vpack.c.bf16 %v66_v14, %v64_v13 }
  0x3a   :  { %v199_v21 = vld [vmem:[#allocation5 + $0x4f8] sm:$0xff]  ;;  %v807_v23 = vpack.c.bf16 %v194_v17, %v192_v15  ;;  %v681_v24 = vpack.c.bf16 %v71_v19, %v69_v18  ;;  %v68_v25 = vld [vmem:[#allocation5 + $0xe0] sm:$0xff]  ;;  %v70_v26 = vld [vmem:[#allocation5 + $0xf0] sm:$0xff] }
  0x3b   :  { %672 = vmatpush1.bf16.msra.mxu1 %v671_v62  ;;  %v196_v27 = vld [vmem:[#allocation5 + $0x4e0] sm:$0xff]  ;;  %v809_v28 = vpack.c.bf16 %v199_v21, %v197_v20  ;;  %v198_v29 = vld [vmem:[#allocation5 + $0x4f0] sm:$0xff]  ;;  %v73_v30 = vld [vmem:[#allocation5 + $0x108] sm:$0xff]  ;;  %v683_v34 = vpack.c.bf16 %v70_v26, %v68_v25  ;;  %v303_v62 = vshrl.u32 %v302_v48, 7 }
  0x3c   :  { %800 = vmatpush1.bf16.msra.mxu0 %v799_v63  ;;  %674 = vmatprep.subr.bf16.mxu1 %v673_v0  ;;  %v75_v31 = vld [vmem:[#allocation5 + $0x118] sm:$0xff]  ;;  %v201_v32 = vld [vmem:[#allocation5 + $0x508] sm:$0xff]  ;;  %v811_v35 = vpack.c.bf16 %v198_v29, %v196_v27  ;;  %v72_v37 = vld [vmem:[#allocation5 + $0x100] sm:$0xff] }
  0x3d   :  { %802 = vmatprep.subr.bf16.mxu0 %v801_v4  ;;  %v203_v33 = vld [vmem:[#allocation5 + $0x518] sm:$0xff]  ;;  %v685_v36 = vpack.c.bf16 %v75_v31, %v73_v30  ;;  %v74_v38 = vld [vmem:[#allocation5 + $0x110] sm:$0xff]  ;;  %v200_v39 = vld [vmem:[#allocation5 + $0x500] sm:$0xff] }
  0x3e   :  { %v813_v40 = vpack.c.bf16 %v203_v33, %v201_v32  ;;  %v202_v41 = vld [vmem:[#allocation5 + $0x510] sm:$0xff]  ;;  %v77_v42 = vld [vmem:[#allocation5 + $0x128] sm:$0xff]  ;;  %v79_v43 = vld [vmem:[#allocation5 + $0x138] sm:$0xff]  ;;  %v687_v49 = vpack.c.bf16 %v74_v38, %v72_v37 }
  0x3f   :  { %676 = vmatpush1.bf16.msra.mxu1 %v675_v10  ;;  %v205_v44 = vld [vmem:[#allocation5 + $0x528] sm:$0xff]  ;;  %v207_v45 = vld [vmem:[#allocation5 + $0x538] sm:$0xff]  ;;  %v815_v50 = vpack.c.bf16 %v202_v41, %v200_v39  ;;  %v689_v51 = vpack.c.bf16 %v79_v43, %v77_v42  ;;  %v76_v52 = vld [vmem:[#allocation5 + $0x120] sm:$0xff] }
  0x40   :  { %804 = vmatpush1.bf16.msra.mxu0 %v803_v11  ;;  %678 = vmatprep.subr.bf16.mxu1 %v677_v12  ;;  %v78_v53 = vld [vmem:[#allocation5 + $0x130] sm:$0xff]  ;;  %v204_v54 = vld [vmem:[#allocation5 + $0x520] sm:$0xff]  ;;  %v817_v55 = vpack.c.bf16 %v207_v45, %v205_v44  ;;  %v81_v57 = vld [vmem:[#allocation5 + $0x148] sm:$0xff]  ;;  %v1047_v11 = vsub.s32 %v301_v61, %v303_v62 }
  0x41   :  { %806 = vmatprep.subr.bf16.mxu0 %v805_v16  ;;  %v206_v56 = vld [vmem:[#allocation5 + $0x530] sm:$0xff]  ;;  %v83_v58 = vld [vmem:[#allocation5 + $0x158] sm:$0xff]  ;;  %v209_v59 = vld [vmem:[#allocation5 + $0x548] sm:$0xff]  ;;  %v691_v63 = vpack.c.bf16 %v78_v53, %v76_v52 }
  0x42   :  { %v211_v60 = vld [vmem:[#allocation5 + $0x558] sm:$0xff]  ;;  %v819_v0 = vpack.c.bf16 %v206_v56, %v204_v54  ;;  %v693_v1 = vpack.c.bf16 %v83_v58, %v81_v57  ;;  %v80_v2 = vld [vmem:[#allocation5 + $0x140] sm:$0xff]  ;;  %v82_v3 = vld [vmem:[#allocation5 + $0x150] sm:$0xff] }
  0x43   :  { %680 = vmatpush1.bf16.msra.mxu1 %v679_v22  ;;  %v208_v4 = vld [vmem:[#allocation5 + $0x540] sm:$0xff]  ;;  %v821_v5 = vpack.c.bf16 %v211_v60, %v209_v59  ;;  %v210_v6 = vld [vmem:[#allocation5 + $0x550] sm:$0xff]  ;;  %v85_v7 = vld [vmem:[#allocation5 + $0x168] sm:$0xff]  ;;  %v695_v12 = vpack.c.bf16 %v82_v3, %v80_v2 }
  0x44   :  { %808 = vmatpush1.bf16.msra.mxu0 %v807_v23  ;;  %682 = vmatprep.subr.bf16.mxu1 %v681_v24  ;;  %v87_v8 = vld [vmem:[#allocation5 + $0x178] sm:$0xff]  ;;  %v213_v9 = vld [vmem:[#allocation5 + $0x568] sm:$0xff]  ;;  %v84_v13 = vld [vmem:[#allocation5 + $0x160] sm:$0xff]  ;;  %v823_v14 = vpack.c.bf16 %v210_v6, %v208_v4 }
  0x45   :  { %810 = vmatprep.subr.bf16.mxu0 %v809_v28  ;;  %v215_v10 = vld [vmem:[#allocation5 + $0x578] sm:$0xff]  ;;  %v697_v15 = vpack.c.bf16 %v87_v8, %v85_v7  ;;  %v86_v16 = vld [vmem:[#allocation5 + $0x170] sm:$0xff]  ;;  %v212_v17 = vld [vmem:[#allocation5 + $0x560] sm:$0xff] }
  0x46   :  { %v214_v18 = vld [vmem:[#allocation5 + $0x570] sm:$0xff]  ;;  %v825_v19 = vpack.c.bf16 %v215_v10, %v213_v9  ;;  %v89_v20 = vld [vmem:[#allocation5 + $0x188] sm:$0xff]  ;;  %v91_v21 = vld [vmem:[#allocation5 + $0x198] sm:$0xff]  ;;  %v699_v27 = vpack.c.bf16 %v86_v16, %v84_v13 }
  0x47   :  { %684 = vmatpush1.bf16.msra.mxu1 %v683_v34  ;;  %v1049_v22 = vld [vmem:[#allocation2] sm:$0xff]  ;;  %v217_v23 = vld [vmem:[#allocation5 + $0x588] sm:$0xff]  ;;  %v219_v24 = vld [vmem:[#allocation5 + $0x598] sm:$0xff]  ;;  %v827_v29 = vpack.c.bf16 %v214_v18, %v212_v17  ;;  %v701_v30 = vpack.c.bf16 %v91_v21, %v89_v20 }
  0x48   :  { %812 = vmatpush1.bf16.msra.mxu0 %v811_v35  ;;  %686 = vmatprep.subr.bf16.mxu1 %v685_v36  ;;  %v1053_v25 = vrot.slane %v1049_v22, %v1047_v11  ;;  %v1055_v26 = vld [vmem:[#allocation2 + $0x8] sm:$0xff]  ;;  %v88_v31 = vld [vmem:[#allocation5 + $0x180] sm:$0xff]  ;;  %v90_v32 = vld [vmem:[#allocation5 + $0x190] sm:$0xff]  ;;  %v829_v35 = vpack.c.bf16 %v219_v24, %v217_v23  ;;  %v298_v10 = vcombine.high %v1049_v22, %v1049_v22 }
  0x49   :  { %814 = vmatprep.subr.bf16.mxu0 %v813_v40  ;;  %v1059_v28 = vrot.slane %v1055_v26, %v1047_v11  ;;  %v216_v33 = vld [vmem:[#allocation5 + $0x580] sm:$0xff]  ;;  %v218_v36 = vld [vmem:[#allocation5 + $0x590] sm:$0xff]  ;;  %v93_v37 = vld [vmem:[#allocation5 + $0x1a8] sm:$0xff]  ;;  %v703_v42 = vpack.c.bf16 %v90_v32, %v88_v31 }
  0x4a   :  { %v313_v34 = vcombine.high %v1053_v25, %v1053_v25  ;;  %v95_v38 = vld [vmem:[#allocation5 + $0x1b8] sm:$0xff]  ;;  %v221_v40 = vld [vmem:[#allocation5 + $0x5a8] sm:$0xff]  ;;  %v831_v43 = vpack.c.bf16 %v218_v36, %v216_v33  ;;  %v92_v45 = vld [vmem:[#allocation5 + $0x1a0] sm:$0xff] }
  0x4b   :  { %688 = vmatpush1.bf16.msra.mxu1 %v687_v49  ;;  %v330_v39 = vcombine.high %v1059_v28, %v1059_v28  ;;  %v223_v41 = vld [vmem:[#allocation5 + $0x5b8] sm:$0xff]  ;;  %v705_v44 = vpack.c.bf16 %v95_v38, %v93_v37  ;;  %v94_v46 = vld [vmem:[#allocation5 + $0x1b0] sm:$0xff]  ;;  %v220_v47 = vld [vmem:[#allocation5 + $0x5a0] sm:$0xff] }
  0x4c   :  { %816 = vmatpush1.bf16.msra.mxu0 %v815_v50  ;;  %690 = vmatprep.subr.bf16.mxu1 %v689_v51  ;;  %v833_v48 = vpack.c.bf16 %v223_v41, %v221_v40  ;;  %v222_v49 = vld [vmem:[#allocation5 + $0x5b0] sm:$0xff]  ;;  %v97_v50 = vld [vmem:[#allocation5 + $0x1c8] sm:$0xff]  ;;  %v99_v51 = vld [vmem:[#allocation5 + $0x1d8] sm:$0xff]  ;;  %v707_v54 = vpack.c.bf16 %v94_v46, %v92_v45 }
  0x4d   :  { %818 = vmatprep.subr.bf16.mxu0 %v817_v55  ;;  %404 = vmatprep.mubr.f32.mxu1 %v313_v34  ;;  %v225_v52 = vld [vmem:[#allocation5 + $0x5c8] sm:$0xff]  ;;  %v227_v53 = vld [vmem:[#allocation5 + $0x5d8] sm:$0xff]  ;;  %v835_v55 = vpack.c.bf16 %v222_v49, %v220_v47  ;;  %v709_v56 = vpack.c.bf16 %v99_v51, %v97_v50  ;;  %v96_v57 = vld [vmem:[#allocation5 + $0x1c0] sm:$0xff] }
  0x4e   :  { %546 = vmatprep.mubr.f32.mxu0 %v330_v39  ;;  %v98_v58 = vld [vmem:[#allocation5 + $0x1d0] sm:$0xff]  ;;  %v224_v59 = vld [vmem:[#allocation5 + $0x5c0] sm:$0xff]  ;;  %v837_v60 = vpack.c.bf16 %v227_v53, %v225_v52  ;;  %v101_v62 = vld [vmem:[#allocation5 + $0x1e8] sm:$0xff] }
  0x4f   :  { %692 = vmatpush1.bf16.msra.mxu1 %v691_v63  ;;  %v226_v61 = vld [vmem:[#allocation5 + $0x5d0] sm:$0xff]  ;;  %v103_v63 = vld [vmem:[#allocation5 + $0x1f8] sm:$0xff]  ;;  %v711_v2 = vpack.c.bf16 %v98_v58, %v96_v57  ;;  %v228_v7 = vld [vmem:[#allocation5 + $0x5e0] sm:$0xff] }
  0x50   :  { %820 = vmatpush1.bf16.msra.mxu0 %v819_v0  ;;  %694 = vmatprep.subr.bf16.mxu1 %v693_v1  ;;  %v229_v0 = vld [vmem:[#allocation5 + $0x5e8] sm:$0xff]  ;;  %v231_v1 = vld [vmem:[#allocation5 + $0x5f8] sm:$0xff]  ;;  %v839_v3 = vpack.c.bf16 %v226_v61, %v224_v59  ;;  %v713_v4 = vpack.c.bf16 %v103_v63, %v101_v62  ;;  %v102_v6 = vld [vmem:[#allocation5 + $0x1f0] sm:$0xff] }
  0x51   :  { %822 = vmatprep.subr.bf16.mxu0 %v821_v5  ;;  %v100_v5 = vld [vmem:[#allocation5 + $0x1e0] sm:$0xff]  ;;  %v841_v8 = vpack.c.bf16 %v231_v1, %v229_v0  ;;  %v230_v9 = vld [vmem:[#allocation5 + $0x5f0] sm:$0xff]  ;;  %v107_v13 = vld [vmem:[#allocation5 + $0x218] sm:$0xff] }
  0x52   :  { %v235_v16 = vld [vmem:[#allocation5 + $0x618] sm:$0xff]  ;;  %v715_v17 = vpack.c.bf16 %v102_v6, %v100_v5  ;;  %v843_v18 = vpack.c.bf16 %v230_v9, %v228_v7  ;;  %v104_v20 = vld [vmem:[#allocation5 + $0x200] sm:$0xff]  ;;  %v106_v21 = vld [vmem:[#allocation5 + $0x210] sm:$0xff] }
  0x53   :  { %696 = vmatpush1.bf16.msra.mxu1 %v695_v12  ;;  %v105_v12 = vld [vmem:[#allocation5 + $0x208] sm:$0xff]  ;;  %v232_v23 = vld [vmem:[#allocation5 + $0x600] sm:$0xff]  ;;  %v239_v31 = vld [vmem:[#allocation5 + $0x638] sm:$0xff]  ;;  %v719_v33 = vpack.c.bf16 %v106_v21, %v104_v20 }
  0x54   :  { %824 = vmatpush1.bf16.msra.mxu0 %v823_v14  ;;  %698 = vmatprep.subr.bf16.mxu1 %v697_v15  ;;  %v315_v14 = vcombine.high %v1055_v26, %v1055_v26  ;;  %v233_v15 = vld [vmem:[#allocation5 + $0x608] sm:$0xff]  ;;  %v108_v36 = vld [vmem:[#allocation5 + $0x220] sm:$0xff]  ;;  %v110_v37 = vld [vmem:[#allocation5 + $0x230] sm:$0xff] }
  0x55   :  { %826 = vmatprep.subr.bf16.mxu0 %v825_v19  ;;  %v717_v19 = vpack.c.bf16 %v107_v13, %v105_v12  ;;  %v845_v24 = vpack.c.bf16 %v235_v16, %v233_v15  ;;  %v109_v22 = vld [vmem:[#allocation5 + $0x228] sm:$0xff]  ;;  %v236_v38 = vld [vmem:[#allocation5 + $0x620] sm:$0xff]  ;;  %v238_v40 = vld [vmem:[#allocation5 + $0x630] sm:$0xff]  ;;  %v723_v46 = vpack.c.bf16 %v110_v37, %v108_v36 }
  0x56   :  { %v237_v26 = vld [vmem:[#allocation5 + $0x628] sm:$0xff]  ;;  %v1073_v32 = vrot.slane %v315_v14, %v1047_v11  ;;  %v851_v47 = vpack.c.bf16 %v238_v40, %v236_v38  ;;  %v112_v49 = vld [vmem:[#allocation5 + $0x240] sm:$0xff]  ;;  %v114_v50 = vld [vmem:[#allocation5 + $0x250] sm:$0xff] }
  0x57   :  { %700 = vmatpush1.bf16.msra.mxu1 %v699_v27  ;;  %v234_v27 = vld [vmem:[#allocation5 + $0x610] sm:$0xff]  ;;  %v849_v39 = vpack.c.bf16 %v239_v31, %v237_v26  ;;  %v113_v41 = vld [vmem:[#allocation5 + $0x248] sm:$0xff]  ;;  %v240_v51 = vld [vmem:[#allocation5 + $0x640] sm:$0xff]  ;;  %v727_v57 = vpack.c.bf16 %v114_v50, %v112_v49 }
  0x58   :  { %828 = vmatpush1.bf16.msra.mxu0 %v827_v29  ;;  %702 = vmatprep.subr.bf16.mxu1 %v701_v30  ;;  %v111_v29 = vld [vmem:[#allocation5 + $0x238] sm:$0xff]  ;;  %v1070_v30 = vrot.slane %v298_v10, %v1047_v11  ;;  %v847_v34 = vpack.c.bf16 %v234_v27, %v232_v23  ;;  %v241_v11 = vld [vmem:[#allocation5 + $0x648] sm:$0xff]  ;;  %v331_v45 = vcombine.high %v1073_v32, %v1073_v32  ;;  %v242_v53 = vld [vmem:[#allocation5 + $0x650] sm:$0xff] }
  0x59   :  { %830 = vmatprep.subr.bf16.mxu0 %v829_v35  ;;  %v721_v35 = vpack.c.bf16 %v111_v29, %v109_v22  ;;  %v116_v59 = vld [vmem:[#allocation5 + $0x260] sm:$0xff]  ;;  %v246_v63 = vld [vmem:[#allocation5 + $0x670] sm:$0xff]  ;;  %v121_v0 = vld [vmem:[#allocation5 + $0x288] sm:$0xff] }
  0x5a   :  { %v244_v61 = vld [vmem:[#allocation5 + $0x660] sm:$0xff]  ;;  %v123_v1 = vld [vmem:[#allocation5 + $0x298] sm:$0xff]  ;;  %v250_v12 = vld [vmem:[#allocation5 + $0x690] sm:$0xff] }
  0x5b   :  { %704 = vmatpush1.bf16.msra.mxu1 %v703_v42  ;;  %v115_v42 = vld [vmem:[#allocation5 + $0x258] sm:$0xff]  ;;  %v859_v5 = vpack.c.bf16 %v246_v63, %v244_v61  ;;  %v733_v6 = vpack.c.bf16 %v123_v1, %v121_v0  ;;  %v120_v7 = vld [vmem:[#allocation5 + $0x280] sm:$0xff]  ;;  %v125_v13 = vld [vmem:[#allocation5 + $0x2a8] sm:$0xff] }
  0x5c   :  { %832 = vmatpush1.bf16.msra.mxu0 %v831_v43  ;;  %706 = vmatprep.subr.bf16.mxu1 %v705_v44  ;;  %v314_v43 = vcombine.high %v1070_v30, %v1070_v30  ;;  %v243_v44 = vld [vmem:[#allocation5 + $0x658] sm:$0xff]  ;;  %v248_v9 = vld [vmem:[#allocation5 + $0x680] sm:$0xff]  ;;  %v253_v15 = vld [vmem:[#allocation5 + $0x6a8] sm:$0xff] }
  0x5d   :  { %834 = vmatprep.subr.bf16.mxu0 %v833_v48  ;;  %v725_v48 = vpack.c.bf16 %v115_v42, %v113_v41  ;;  %v853_v52 = vpack.c.bf16 %v243_v44, %v241_v11  ;;  %v127_v14 = vld [vmem:[#allocation5 + $0x2b8] sm:$0xff]  ;;  %v124_v20 = vld [vmem:[#allocation5 + $0x2a0] sm:$0xff]  ;;  %v126_v21 = vld [vmem:[#allocation5 + $0x2b0] sm:$0xff] }
  0x5e   :  { %v255_v16 = vld [vmem:[#allocation5 + $0x6b8] sm:$0xff]  ;;  %v252_v23 = vld [vmem:[#allocation5 + $0x6a0] sm:$0xff]  ;;  %v254_v27 = vld [vmem:[#allocation5 + $0x6b0] sm:$0xff] }
  0x5f   :  { %708 = vmatpush1.bf16.msra.mxu1 %v707_v54  ;;  %v119_v54 = vld [vmem:[#allocation5 + $0x278] sm:$0xff]  ;;  %v129_v22 = vld [vmem:[#allocation5 + $0x2c8] sm:$0xff]  ;;  %v128_v36 = vld [vmem:[#allocation5 + $0x2c0] sm:$0xff] }
  0x60   :  { %836 = vmatpush1.bf16.msra.mxu0 %v835_v55  ;;  %710 = vmatprep.subr.bf16.mxu1 %v709_v56  ;;  %v245_v55 = vld [vmem:[#allocation5 + $0x668] sm:$0xff]  ;;  %v247_v56 = vld [vmem:[#allocation5 + $0x678] sm:$0xff]  ;;  %v130_v37 = vld [vmem:[#allocation5 + $0x2d0] sm:$0xff] }
  0x61   :  { %838 = vmatprep.subr.bf16.mxu0 %v837_v60  ;;  %v118_v60 = vld [vmem:[#allocation5 + $0x270] sm:$0xff]  ;;  %v857_v62 = vpack.c.bf16 %v247_v56, %v245_v55  ;;  %v131_v29 = vld [vmem:[#allocation5 + $0x2d8] sm:$0xff]  ;;  %v257_v26 = vld [vmem:[#allocation5 + $0x6c8] sm:$0xff]  ;;  %v743_v44 = vpack.c.bf16 %v130_v37, %v128_v36 }
  0x62   :  { %v259_v31 = vld [vmem:[#allocation5 + $0x6d8] sm:$0xff]  ;;  %v256_v38 = vld [vmem:[#allocation5 + $0x6c0] sm:$0xff]  ;;  %v258_v40 = vld [vmem:[#allocation5 + $0x6d0] sm:$0xff] }
  0x63   :  { %712 = vmatpush1.bf16.msra.mxu1 %v711_v2  ;;  %v249_v2 = vld [vmem:[#allocation5 + $0x688] sm:$0xff]  ;;  %v135_v42 = vld [vmem:[#allocation5 + $0x2f8] sm:$0xff]  ;;  %v260_v49 = vld [vmem:[#allocation5 + $0x6e0] sm:$0xff] }
  0x64   :  { %840 = vmatpush1.bf16.msra.mxu0 %v839_v3  ;;  %714 = vmatprep.subr.bf16.mxu1 %v713_v4  ;;  %v251_v3 = vld [vmem:[#allocation5 + $0x698] sm:$0xff]  ;;  %v731_v4 = vpack.c.bf16 %v118_v60, %v116_v59  ;;  %v133_v41 = vld [vmem:[#allocation5 + $0x2e8] sm:$0xff]  ;;  %v264_v59 = vld [vmem:[#allocation5 + $0x700] sm:$0xff] }
  0x65   :  { %842 = vmatprep.subr.bf16.mxu0 %v841_v8  ;;  %v122_v8 = vld [vmem:[#allocation5 + $0x290] sm:$0xff]  ;;  %v861_v10 = vpack.c.bf16 %v251_v3, %v249_v2  ;;  %v263_v11 = vld [vmem:[#allocation5 + $0x6f8] sm:$0xff]  ;;  %v269_v0 = vld [vmem:[#allocation5 + $0x728] sm:$0xff] }
  0x66   :  { %v266_v61 = vld [vmem:[#allocation5 + $0x710] sm:$0xff]  ;;  %v143_v63 = vld [vmem:[#allocation5 + $0x338] sm:$0xff]  ;;  %v276_v36 = vld [vmem:[#allocation5 + $0x760] sm:$0xff] }
  0x67   :  { %716 = vmatpush1.bf16.msra.mxu1 %v715_v17  ;;  %v735_v17 = vpack.c.bf16 %v122_v8, %v120_v7  ;;  %v271_v1 = vld [vmem:[#allocation5 + $0x738] sm:$0xff]  ;;  %v879_v3 = vpack.c.bf16 %v266_v61, %v264_v59  ;;  %v268_v7 = vld [vmem:[#allocation5 + $0x720] sm:$0xff]  ;;  %v286_v59 = vld [vmem:[#allocation5 + $0x7b0] sm:$0xff] }
  0x68   :  { %844 = vmatpush1.bf16.msra.mxu0 %v843_v18  ;;  %718 = vmatprep.subr.bf16.mxu1 %v717_v19  ;;  %v863_v18 = vpack.c.bf16 %v250_v12, %v248_v9  ;;  %v737_v19 = vpack.c.bf16 %v127_v14, %v125_v13  ;;  %v881_v8 = vpack.c.bf16 %v271_v1, %v269_v0  ;;  %v270_v9 = vld [vmem:[#allocation5 + $0x730] sm:$0xff]  ;;  %v147_v12 = vld [vmem:[#allocation5 + $0x358] sm:$0xff]  ;;  %v273_v13 = vld [vmem:[#allocation5 + $0x748] sm:$0xff] }
  0x69   :  { %846 = vmatprep.subr.bf16.mxu0 %v845_v24  ;;  %v865_v24 = vpack.c.bf16 %v255_v16, %v253_v15  ;;  %v275_v14 = vld [vmem:[#allocation5 + $0x758] sm:$0xff]  ;;  %v883_v16 = vpack.c.bf16 %v270_v9, %v268_v7  ;;  %v290_v7 = vld [vmem:[#allocation5 + $0x7d0] sm:$0xff] }
  0x6a   :  { %405 = vmatmul.mubr.f32.vlgmr.msra.gmra.mrb[0].mxu1 %v1053_v25  ;;  %v117_v25 = vld [vmem:[#allocation5 + $0x268] sm:$0xff]  ;;  %v163_v61 = vld [vmem:[#allocation5 + $0x3d8] sm:$0xff] }
  0x6b   :  { %720 = vmatpush1.bf16.msra.mxu1 %v719_v33  ;;  %547 = vmatmul.mubr.f32.vlgmr.msra.gmra.mrb[0].mxu0 %v1059_v28  ;;  %v855_v28 = vpack.c.bf16 %v242_v53, %v240_v51  ;;  %v729_v58 = vpack.c.bf16 %v119_v54, %v117_v25  ;;  %v739_v33 = vpack.c.bf16 %v126_v21, %v124_v20  ;;  %v262_v51 = vld [vmem:[#allocation5 + $0x6f0] sm:$0xff]  ;;  %v139_v53 = vld [vmem:[#allocation5 + $0x318] sm:$0xff]  ;;  %v265_v25 = vld [vmem:[#allocation5 + $0x708] sm:$0xff] }
  0x6c   :  { %848 = vmatpush1.bf16.msra.mxu0 %v847_v34  ;;  %722 = vmatprep.subr.bf16.mxu1 %v721_v35  ;;  %v867_v34 = vpack.c.bf16 %v254_v27, %v252_v23  ;;  %v741_v35 = vpack.c.bf16 %v131_v29, %v129_v22  ;;  %v267_v54 = vld [vmem:[#allocation5 + $0x718] sm:$0xff]  ;;  %v875_v56 = vpack.c.bf16 %v262_v51, %v260_v49  ;;  %v272_v20 = vld [vmem:[#allocation5 + $0x740] sm:$0xff]  ;;  %v274_v23 = vld [vmem:[#allocation5 + $0x750] sm:$0xff] }
  0x6d   :  { %850 = vmatprep.subr.bf16.mxu0 %v849_v39  ;;  %475 = vmatprep.mubr.f32.mxu1 %v314_v43  ;;  %v869_v39 = vpack.c.bf16 %v259_v31, %v257_v26  ;;  %v261_v43 = vld [vmem:[#allocation5 + $0x6e8] sm:$0xff]  ;;  %v877_v60 = vpack.c.bf16 %v267_v54, %v265_v25  ;;  %v885_v21 = vpack.c.bf16 %v275_v14, %v273_v13  ;;  %v151_v27 = vld [vmem:[#allocation5 + $0x378] sm:$0xff]  ;;  %v282_v49 = vld [vmem:[#allocation5 + $0x790] sm:$0xff] }
  0x6e   :  { %617 = vmatprep.mubr.f32.mxu0 %v331_v45  ;;  %v871_v45 = vpack.c.bf16 %v258_v40, %v256_v38  ;;  %v873_v50 = vpack.c.bf16 %v263_v11, %v261_v43  ;;  %v277_v22 = vld [vmem:[#allocation5 + $0x768] sm:$0xff]  ;;  %v279_v29 = vld [vmem:[#allocation5 + $0x778] sm:$0xff]  ;;  %v887_v31 = vpack.c.bf16 %v274_v23, %v272_v20  ;;  %v278_v38 = vld [vmem:[#allocation5 + $0x770] sm:$0xff] }
  0x6f   :  { %724 = vmatpush1.bf16.msra.mxu1 %v723_v46  ;;  %v745_v46 = vpack.c.bf16 %v135_v42, %v133_v41  ;;  %v889_v37 = vpack.c.bf16 %v279_v29, %v277_v22  ;;  %v155_v40 = vld [vmem:[#allocation5 + $0x398] sm:$0xff]  ;;  %v281_v41 = vld [vmem:[#allocation5 + $0x788] sm:$0xff]  ;;  %v891_v11 = vpack.c.bf16 %v278_v38, %v276_v36  ;;  %v294_v20 = vld [vmem:[#allocation5 + $0x7f0] sm:$0xff] }
  0x70   :  { %852 = vmatpush1.bf16.msra.mxu0 %v851_v47  ;;  %726 = vmatprep.subr.bf16.mxu1 %v725_v48  ;;  %v132_v47 = vld [vmem:[#allocation5 + $0x2e0] sm:$0xff]  ;;  %v134_v48 = vld [vmem:[#allocation5 + $0x2f0] sm:$0xff]  ;;  %v283_v42 = vld [vmem:[#allocation5 + $0x798] sm:$0xff] }
  0x71   :  { %854 = vmatprep.subr.bf16.mxu0 %v853_v52  ;;  %v137_v52 = vld [vmem:[#allocation5 + $0x308] sm:$0xff]  ;;  %v747_v55 = vpack.c.bf16 %v134_v48, %v132_v47  ;;  %v280_v47 = vld [vmem:[#allocation5 + $0x780] sm:$0xff]  ;;  %v893_v48 = vpack.c.bf16 %v283_v42, %v281_v41  ;;  %v159_v51 = vld [vmem:[#allocation5 + $0x3b8] sm:$0xff] }
  0x72   :  { %v895_v54 = vpack.c.bf16 %v282_v49, %v280_v47  ;;  %v167_v9 = vld [vmem:[#allocation5 + $0x3f8] sm:$0xff] }
  0x73   :  { %728 = vmatpush1.bf16.msra.mxu1 %v727_v57  ;;  %v749_v57 = vpack.c.bf16 %v139_v53, %v137_v52  ;;  %v285_v52 = vld [vmem:[#allocation5 + $0x7a8] sm:$0xff]  ;;  %v287_v53 = vld [vmem:[#allocation5 + $0x7b8] sm:$0xff] }
  0x74   :  { %856 = vmatpush1.bf16.msra.mxu0 %v855_v28  ;;  %730 = vmatprep.subr.bf16.mxu1 %v729_v58  ;;  %v136_v28 = vld [vmem:[#allocation5 + $0x300] sm:$0xff]  ;;  %v138_v58 = vld [vmem:[#allocation5 + $0x310] sm:$0xff] }
  0x75   :  { %858 = vmatprep.subr.bf16.mxu0 %v857_v62  ;;  %v141_v62 = vld [vmem:[#allocation5 + $0x328] sm:$0xff]  ;;  %v751_v2 = vpack.c.bf16 %v138_v58, %v136_v28  ;;  %v284_v28 = vld [vmem:[#allocation5 + $0x7a0] sm:$0xff]  ;;  %v897_v58 = vpack.c.bf16 %v287_v53, %v285_v52 }
  0x76   :  { %v899_v1 = vpack.c.bf16 %v286_v59, %v284_v28 }
  0x77   :  { %732 = vmatpush1.bf16.msra.mxu1 %v731_v4  ;;  %v753_v4 = vpack.c.bf16 %v143_v63, %v141_v62  ;;  %v289_v62 = vld [vmem:[#allocation5 + $0x7c8] sm:$0xff]  ;;  %v291_v63 = vld [vmem:[#allocation5 + $0x7d8] sm:$0xff] }
  0x78   :  { %860 = vmatpush1.bf16.msra.mxu0 %v859_v5  ;;  %734 = vmatprep.subr.bf16.mxu1 %v733_v6  ;;  %v140_v5 = vld [vmem:[#allocation5 + $0x320] sm:$0xff]  ;;  %v142_v6 = vld [vmem:[#allocation5 + $0x330] sm:$0xff] }
  0x79   :  { %862 = vmatprep.subr.bf16.mxu0 %v861_v10  ;;  %v145_v10 = vld [vmem:[#allocation5 + $0x348] sm:$0xff]  ;;  %v755_v15 = vpack.c.bf16 %v142_v6, %v140_v5  ;;  %v288_v5 = vld [vmem:[#allocation5 + $0x7c0] sm:$0xff]  ;;  %v901_v6 = vpack.c.bf16 %v291_v63, %v289_v62 }
  0x7a   :  { %v903_v14 = vpack.c.bf16 %v290_v7, %v288_v5 }
  0x7b   :  { %736 = vmatpush1.bf16.msra.mxu1 %v735_v17  ;;  %v757_v17 = vpack.c.bf16 %v147_v12, %v145_v10  ;;  %v293_v10 = vld [vmem:[#allocation5 + $0x7e8] sm:$0xff]  ;;  %v295_v12 = vld [vmem:[#allocation5 + $0x7f8] sm:$0xff] }
  0x7c   :  { %864 = vmatpush1.bf16.msra.mxu0 %v863_v18  ;;  %738 = vmatprep.subr.bf16.mxu1 %v737_v19  ;;  %v144_v18 = vld [vmem:[#allocation5 + $0x340] sm:$0xff]  ;;  %v146_v19 = vld [vmem:[#allocation5 + $0x350] sm:$0xff] }
  0x7d   :  { %866 = vmatprep.subr.bf16.mxu0 %v865_v24  ;;  %v149_v24 = vld [vmem:[#allocation5 + $0x368] sm:$0xff]  ;;  %v759_v26 = vpack.c.bf16 %v146_v19, %v144_v18  ;;  %v905_v18 = vpack.c.bf16 %v295_v12, %v293_v10  ;;  %v292_v19 = vld [vmem:[#allocation5 + $0x7e0] sm:$0xff] }
  0x7e   :  { %v907_v23 = vpack.c.bf16 %v294_v20, %v292_v19 }
  0x7f   :  { %740 = vmatpush1.bf16.msra.mxu1 %v739_v33  ;;  %v761_v33 = vpack.c.bf16 %v151_v27, %v149_v24 }
  0x80   :  { %868 = vmatpush1.bf16.msra.mxu0 %v867_v34  ;;  %742 = vmatprep.subr.bf16.mxu1 %v741_v35  ;;  %v148_v34 = vld [vmem:[#allocation5 + $0x360] sm:$0xff]  ;;  %v150_v35 = vld [vmem:[#allocation5 + $0x370] sm:$0xff] }
  0x81   :  { %870 = vmatprep.subr.bf16.mxu0 %v869_v39  ;;  %v153_v39 = vld [vmem:[#allocation5 + $0x388] sm:$0xff]  ;;  %v763_v43 = vpack.c.bf16 %v150_v35, %v148_v34 }
  0x83   :  { %744 = vmatpush1.bf16.msra.mxu1 %v743_v44  ;;  %v765_v44 = vpack.c.bf16 %v155_v40, %v153_v39 }
  0x84   :  { %872 = vmatpush1.bf16.msra.mxu0 %v871_v45  ;;  %746 = vmatprep.subr.bf16.mxu1 %v745_v46  ;;  %v152_v45 = vld [vmem:[#allocation5 + $0x380] sm:$0xff]  ;;  %v154_v46 = vld [vmem:[#allocation5 + $0x390] sm:$0xff] }
  0x85   :  { %874 = vmatprep.subr.bf16.mxu0 %v873_v50  ;;  %v157_v50 = vld [vmem:[#allocation5 + $0x3a8] sm:$0xff]  ;;  %v767_v25 = vpack.c.bf16 %v154_v46, %v152_v45 }
  0x87   :  { %748 = vmatpush1.bf16.msra.mxu1 %v747_v55  ;;  %v769_v55 = vpack.c.bf16 %v159_v51, %v157_v50 }
  0x88   :  { %876 = vmatpush1.bf16.msra.mxu0 %v875_v56  ;;  %750 = vmatprep.subr.bf16.mxu1 %v749_v57  ;;  %v156_v56 = vld [vmem:[#allocation5 + $0x3a0] sm:$0xff]  ;;  %v158_v57 = vld [vmem:[#allocation5 + $0x3b0] sm:$0xff] }
  0x89   :  { %878 = vmatprep.subr.bf16.mxu0 %v877_v60  ;;  %v161_v60 = vld [vmem:[#allocation5 + $0x3c8] sm:$0xff]  ;;  %v771_v0 = vpack.c.bf16 %v158_v57, %v156_v56 }
  0x8b   :  { %752 = vmatpush1.bf16.msra.mxu1 %v751_v2  ;;  %v773_v2 = vpack.c.bf16 %v163_v61, %v161_v60 }
  0x8c   :  { %880 = vmatpush1.bf16.msra.mxu0 %v879_v3  ;;  %754 = vmatprep.subr.bf16.mxu1 %v753_v4  ;;  %v160_v3 = vld [vmem:[#allocation5 + $0x3c0] sm:$0xff]  ;;  %v162_v4 = vld [vmem:[#allocation5 + $0x3d0] sm:$0xff] }
  0x8d   :  { %882 = vmatprep.subr.bf16.mxu0 %v881_v8  ;;  %v165_v8 = vld [vmem:[#allocation5 + $0x3e8] sm:$0xff]  ;;  %v775_v13 = vpack.c.bf16 %v162_v4, %v160_v3 }
  0x8f   :  { %756 = vmatpush1.bf16.msra.mxu1 %v755_v15  ;;  %v777_v15 = vpack.c.bf16 %v167_v9, %v165_v8 }
  0x90   :  { %884 = vmatpush1.bf16.msra.mxu0 %v883_v16  ;;  %758 = vmatprep.subr.bf16.mxu1 %v757_v17  ;;  %v164_v16 = vld [vmem:[#allocation5 + $0x3e0] sm:$0xff]  ;;  %v166_v17 = vld [vmem:[#allocation5 + $0x3f0] sm:$0xff] }
  0x91   :  { %886 = vmatprep.subr.bf16.mxu0 %v885_v21  ;;  %v779_v21 = vpack.c.bf16 %v166_v17, %v164_v16 }
  0x93   :  { %760 = vmatpush1.bf16.msra.mxu1 %v759_v26 }
  0x94   :  { %888 = vmatpush1.bf16.msra.mxu0 %v887_v31  ;;  %762 = vmatprep.subr.bf16.mxu1 %v761_v33 }
  0x95   :  { %890 = vmatprep.subr.bf16.mxu0 %v889_v37 }
  0x97   :  { %764 = vmatpush1.bf16.msra.mxu1 %v763_v43 }
  0x98   :  { %892 = vmatpush1.bf16.msra.mxu0 %v891_v11  ;;  %766 = vmatprep.subr.bf16.mxu1 %v765_v44 }
  0x99   :  { %894 = vmatprep.subr.bf16.mxu0 %v893_v48 }
  0x9b   :  { %768 = vmatpush1.bf16.msra.mxu1 %v767_v25 }
  0x9c   :  { %896 = vmatpush1.bf16.msra.mxu0 %v895_v54  ;;  %770 = vmatprep.subr.bf16.mxu1 %v769_v55 }
  0x9d   :  { %898 = vmatprep.subr.bf16.mxu0 %v897_v58 }
  0x9f   :  { %772 = vmatpush1.bf16.msra.mxu1 %v771_v0 }
  0xa0   :  { %900 = vmatpush1.bf16.msra.mxu0 %v899_v1  ;;  %774 = vmatprep.subr.bf16.mxu1 %v773_v2 }
  0xa1   :  { %902 = vmatprep.subr.bf16.mxu0 %v901_v6 }
  0xa3   :  { %776 = vmatpush1.bf16.msra.mxu1 %v775_v13 }
  0xa4   :  { %904 = vmatpush1.bf16.msra.mxu0 %v903_v14  ;;  %778 = vmatprep.subr.bf16.mxu1 %v777_v15 }
  0xa5   :  { %906 = vmatprep.subr.bf16.mxu0 %v905_v18 }
  0xa7   :  { %780 = vmatpush1.bf16.msra.mxu1 %v779_v21 }
  0xa8   :  { %908 = vmatpush1.bf16.msra.mxu0 %v907_v23 }
  0xaa   :  { %476 = vmatmul.mubr.f32.vlgmr.msra.gmra.mrb[0].mxu1 %v1070_v30 }
  0xab   :  { %618 = vmatmul.mubr.f32.vlgmr.msra.gmra.mrb[0].mxu0 %v1073_v32 }
 0x17d   :  { %v477_v24 = vpop.f32.mrb[0].mxu1 }
 0x17e   :  { %v619_v27 = vpop.f32.mrb[0].mxu0  ;;  %v479_v22 = vpop.f32.mrb[1].mxu1 }
 0x17f   :  { %v909_v29 = vadd.f32 %v619_v27, %v477_v24  ;;  %v621_v26 = vpop.f32.mrb[1].mxu0 }
 0x180   :  { %v910_v31 = vadd.f32 %v621_v26, %v479_v22 }
 0x182   :  { %v626_v33 = vcombine.low %v909_v29, %v910_v31 }
 0x184   :  { %652 = vst.sshfl [vmem:[#allocation7] sm:$0x33 pattern:$0x76325410] %v626_v33 }
 0x185   :  { %978 = shalt.err (!%p975_p6)
}
 0x186   :  { %s979_s10 = scalar_lea.hbm %s1097_s2, 64 }
 0x187   :  { %p980_p7 = scmp.ne.s32.totalorder %s1097_s2, %s979_s10  ;;  %p983_p8 = scmp.lt.u32.totalorder %s979_s10, %s1097_s2 }
 0x189   :  { %p985_p9 = pnand %p983_p8, %p980_p7 }
 0x18b   :  { %988 = shalt.err (!%p985_p9)
}
 0x18c   :  { %645 = dma.vmem_to_hbm [thread:$0]  %s643_s6, 64, %s1097_s2, [#allocation4]  }
 0x18d   :  { %993 = dma.done.wait [#allocation4], 64  }
 0x18e   :  { %994 = vsyncadd [#allocation4], 4294967232 }
 0x18f   :  { %649 = vsyncpa [#allocation3], 1 }
 0x190   :  { %650 = vsyncpa [#allocation6], 1 }
 0x191   :  { %651 = vsyncpa [#allocation4], 1 }

</bundles_post_ra>
